<compile_context>
chip_gen: v6e
topology: v6e:2x2x1
jax: 0.10.0
libtpu: 0.0.40
codegen_flags: <defaults>
</compile_context>

<pallas_src>
import jax
import jax.numpy as jnp
from jax.experimental import pallas as pl
from jax.experimental.pallas import tpu as pltpu

LANE = 128


def _round_up(x, m):
    return ((x + m - 1) // m) * m


def _conv_banded(x, wband_ref):
    """One VALID conv layer as a single MXU matmul on a lane-dense slab.

    x:         (NB, H, Lin) f32 activation slab (NHWC with W,C flattened and
               zero-padded to a multiple of 128 lanes)
    wband_ref: (Kh*Lin, Lout) VMEM ref of block-banded weights (bf16)
    returns:   (NB, Ho, Lout) f32, Ho = H - Kh + 1
    """
    nb, h, lin = x.shape
    kh_total = wband_ref.shape[0] // lin
    lout = wband_ref.shape[1]
    ho = h - kh_total + 1
    xc = x.astype(wband_ref.dtype)
    # Fold the Kh taps into one contraction: concatenate the kh-shifted row
    # windows along the lane axis.  Each piece is a multiple of 128 lanes, so
    # the concatenation is tile-aligned.
    lhs = jnp.concatenate([xc[:, kh:kh + ho, :] for kh in range(kh_total)],
                          axis=-1)
    lhs = lhs.reshape(nb * ho, kh_total * lin)
    y = jnp.dot(lhs, wband_ref[...], preferred_element_type=jnp.float32)
    return y.reshape(nb, ho, lout)


def cmfm_kernel(rgb_ref, ir_ref, w7_ref, w5_ref, w3a_ref, w3b_ref, out_ref):
    x = ir_ref[...].astype(jnp.float32)            # (NB, H, Lin) slab
    x = jnp.maximum(_conv_banded(x, w7_ref), 0.0)  # ReLU in f32 on the VPU
    x = jnp.maximum(_conv_banded(x, w5_ref), 0.0)
    x = jnp.maximum(_conv_banded(x, w3a_ref), 0.0)
    y = _conv_banded(x, w3b_ref)                   # (NB, Ho, Lout); r == b == y
    rgb = rgb_ref[...].astype(jnp.float32)
    out_ref[...] = (rgb * y + y).astype(out_ref.dtype)


def _banded_weights(w_oihw, w_in, dtype):
    """OIHW conv weight -> (Kh * in_pad, out_pad) block-banded matmul weight.

    True band: band[kh, (wo+kw)*Cin + ci, wo*Cout + co] = w[kh, kw, ci, co].
    Rows (per-kh block) are zero-padded from W*Cin to a 128 multiple and the
    columns from Wo*Cout to a 128 multiple so activation slabs stay lane-dense.
    """
    w = jnp.transpose(w_oihw, (2, 3, 1, 0)).astype(jnp.float32)  # (Kh,Kw,Cin,Cout)
    kh_, kw_, cin, cout = w.shape
    w_out = w_in - kw_ + 1
    rows = jnp.arange(w_in)[:, None]
    cols = jnp.arange(w_out)[None, :]
    band = jnp.zeros((kh_, w_in, cin, w_out, cout), jnp.float32)
    for kw in range(kw_):                           # tiny, build-time only
        ind = (rows == cols + kw).astype(jnp.float32)            # (W, Wo)
        band = band + jnp.einsum('wv,kio->kwivo', ind, w[:, kw])
    band = band.reshape(kh_, w_in * cin, w_out * cout)
    in_pad = _round_up(w_in * cin, LANE)
    out_pad = _round_up(w_out * cout, LANE)
    band = jnp.pad(band, ((0, 0), (0, in_pad - w_in * cin),
                          (0, out_pad - w_out * cout)))
    return band.reshape(kh_ * in_pad, out_pad).astype(dtype)


def make_cmfm_forward(w7, w5, w3a, w3b, *, batch, dim, h_in, w_in,
                      out_dtype=jnp.float32, band_dtype=jnp.bfloat16):
    """Builds band weights ONCE and returns a jitted forward(rgb_nchw, ir_nchw)."""
    ks = (7, 5, 3, 3)
    h_out = h_in - sum(k - 1 for k in ks)
    w_out = w_in - sum(k - 1 for k in ks)
    assert h_out > 0 and w_out > 0, "ir too small for the VALID 7/5/3/3 chain"

    # Band weights (cached; the returned closure reuses them on every call).
    bands = []
    wl = w_in
    for w_oihw, k in zip((w7, w5, w3a, w3b), ks):
        bands.append(_banded_weights(w_oihw, wl, band_dtype))
        wl -= k - 1
    wb7, wb5, wb3a, wb3b = bands

    in_lanes = _round_up(w_in * dim, LANE)     # padded lane width of ir slab
    out_lanes = _round_up(w_out * dim, LANE)   # padded lane width of output slab

    # Batch blocking: fill ~128 MXU sublane rows per dot, but keep the grid
    # length >= 2 when batch >= 2 so both v7x TensorCores get work.
    rows0 = h_in - (ks[0] - 1)
    nb = max(1, min(batch, LANE // max(1, rows0)))
    if batch >= 2:
        nb = max(1, min(nb, batch // 2))
    grid_n = pl.cdiv(batch, nb)
    n_pad = grid_n * nb
    # TODO(synk): for batch == 1 on v7x, split the grid over output-row tiles
    # instead so the second TensorCore is not idle.

    # Advisory cost estimate for XLA scheduling.
    flops = 0
    h, lin = h_in, in_lanes
    for k, b in zip(ks, bands):
        ho_l = h - k + 1
        flops += 2 * ho_l * int(b.shape[0]) * int(b.shape[1])
        h, lin = ho_l, int(b.shape[1])
    flops = n_pad * (flops + 2 * h_out * out_lanes)
    bytes_accessed = (4 * n_pad * (h_in * in_lanes + 2 * h_out * out_lanes)
                      + sum(int(b.size) * b.dtype.itemsize for b in bands))
    cost = pl.CostEstimate(flops=int(flops), transcendentals=0,
                           bytes_accessed=int(bytes_accessed))

    def full_spec(shape):
        return pl.BlockSpec(shape, lambda i: (0,) * len(shape))

    call = pl.pallas_call(
        cmfm_kernel,
        out_shape=jax.ShapeDtypeStruct((n_pad, h_out, out_lanes), out_dtype),
        grid=(grid_n,),
        in_specs=[
            pl.BlockSpec((nb, h_out, out_lanes), lambda i: (i, 0, 0)),   # rgb
            pl.BlockSpec((nb, h_in, in_lanes), lambda i: (i, 0, 0)),     # ir
            full_spec(wb7.shape), full_spec(wb5.shape),
            full_spec(wb3a.shape), full_spec(wb3b.shape),
        ],
        out_specs=pl.BlockSpec((nb, h_out, out_lanes), lambda i: (i, 0, 0)),
        compiler_params=pltpu.CompilerParams(
            dimension_semantics=("parallel",),
            vmem_limit_bytes=64 * 1024 * 1024),
        cost_estimate=cost,
    )

    def forward(rgb_nchw, ir_nchw):
        assert ir_nchw.shape == (batch, dim, h_in, w_in)
        assert rgb_nchw.shape == (batch, dim, h_out, w_out), (
            "rgb spatial dims must equal the VALID 7/5/3/3 chain output")
        ir = jnp.transpose(ir_nchw, (0, 2, 3, 1)).reshape(batch, h_in, w_in * dim)
        rgb = jnp.transpose(rgb_nchw, (0, 2, 3, 1)).reshape(batch, h_out,
                                                            w_out * dim)
        ir = jnp.pad(ir, ((0, n_pad - batch), (0, 0),
                          (0, in_lanes - w_in * dim)))
        rgb = jnp.pad(rgb, ((0, n_pad - batch), (0, 0),
                            (0, out_lanes - w_out * dim)))
        out = call(rgb, ir, wb7, wb5, wb3a, wb3b)
        out = out[:batch, :, :w_out * dim].reshape(batch, h_out, w_out, dim)
        return jnp.transpose(out, (0, 3, 1, 2))    # back to NCHW

    return jax.jit(forward)


def cmfm_reference(rgb_nchw, ir_nchw, w7, w5, w3a, w3b,
                   compute_dtype=jnp.bfloat16):
    """Pure-JAX reference, precision-matched (bf16 operands, f32 accumulation)."""
    x = ir_nchw
    for w, relu in ((w7, True), (w5, True), (w3a, True), (w3b, False)):
        x = jax.lax.conv_general_dilated(
            x.astype(compute_dtype), w.astype(compute_dtype),
            window_strides=(1, 1), padding="VALID",
            dimension_numbers=("NCHW", "OIHW", "NCHW"),
            preferred_element_type=jnp.float32)
        if relu:
            x = jnp.maximum(x, 0.0)
    return rgb_nchw * x + x


if __name__ == "__main__":
    dim = 4            # channels
    n = 2              # batch
    h_in = w_in = 22   # ir spatial; VALID 7+5+3+3 convs -> 8x8 output
    h_out = w_out = h_in - 6 - 4 - 2 - 2  # = 8; rgb must match ir_block output

    key = jax.random.PRNGKey(0)
    k_rgb, k_ir, k7, k5, k3a, k3b = jax.random.split(key, 6)

    rgb = jax.random.normal(k_rgb, (n, dim, h_out, w_out), jnp.float32)
    ir = jax.random.normal(k_ir, (n, dim, h_in, w_in), jnp.float32)

    def init_w(k, ksz):
        fan_in = dim * ksz * ksz
        return jax.random.normal(k, (dim, dim, ksz, ksz), jnp.float32) * (
            (2.0 / fan_in) ** 0.5)

    w7 = init_w(k7, 7)
    w5 = init_w(k5, 5)
    w3a = init_w(k3a, 3)
    w3b = init_w(k3b, 3)

    fwd = make_cmfm_forward(w7, w5, w3a, w3b, batch=n, dim=dim,
                            h_in=h_in, w_in=w_in)
    out = fwd(rgb, ir)
    jax.block_until_ready(out)

    ref = cmfm_reference(rgb, ir, w7, w5, w3a, w3b)
    assert out.shape == (n, dim, h_out, w_out)
    err = float(jnp.max(jnp.abs(out - ref)))
    assert jnp.allclose(out, ref, atol=1e-2, rtol=1e-2), f"max abs err = {err}"

    print("KERNEL_OK")
</pallas_src>

<mosaic_0001>
module attributes {stable_mosaic.version = 11 : i64} {
  func.func @cmfm_kernel(%arg0: i32, %arg1: memref<1x8x128xf32, #tpu.memory_space<vmem>>, %arg2: memref<1x22x128xf32, #tpu.memory_space<vmem>>, %arg3: memref<896x128xbf16, #tpu.memory_space<vmem>>, %arg4: memref<640x128xbf16, #tpu.memory_space<vmem>>, %arg5: memref<384x128xbf16, #tpu.memory_space<vmem>>, %arg6: memref<384x128xbf16, #tpu.memory_space<vmem>>, %arg7: memref<1x8x128xf32, #tpu.memory_space<vmem>>) attributes {dimension_semantics = [#tpu.dimension_semantics<parallel>], iteration_bounds = array<i64: 2>, scalar_prefetch = 0 : i64, scratch_operands = 0 : i64, tpu.core_type = #tpu.core_type<tc>, window_params = [{transform_indices = @transform_0, window_bounds = array<i64: 1, 8, 128>}, {transform_indices = @transform_1, window_bounds = array<i64: 1, 22, 128>}, {pipeline_mode = #tpu.pipeline_mode<synchronous>, transform_indices = @transform_2, window_bounds = array<i64: 896, 128>}, {pipeline_mode = #tpu.pipeline_mode<synchronous>, transform_indices = @transform_3, window_bounds = array<i64: 640, 128>}, {pipeline_mode = #tpu.pipeline_mode<synchronous>, transform_indices = @transform_4, window_bounds = array<i64: 384, 128>}, {pipeline_mode = #tpu.pipeline_mode<synchronous>, transform_indices = @transform_5, window_bounds = array<i64: 384, 128>}, {transform_indices = @transform_6, window_bounds = array<i64: 1, 8, 128>}]} {
    %c0 = arith.constant 0 : index
    %c0_0 = arith.constant 0 : index
    %c0_1 = arith.constant 0 : index
    %0 = vector.load %arg2[%c0, %c0_0, %c0_1] : memref<1x22x128xf32, #tpu.memory_space<vmem>>, vector<1x22x128xf32>
    %1 = arith.truncf %0 : vector<1x22x128xf32> to vector<1x22x128xbf16>
    %2 = vector.extract_strided_slice %1 {offsets = [0, 0, 0], sizes = [1, 16, 128], strides = [1, 1, 1]} : vector<1x22x128xbf16> to vector<1x16x128xbf16>
    %3 = vector.extract_strided_slice %1 {offsets = [0, 1, 0], sizes = [1, 16, 128], strides = [1, 1, 1]} : vector<1x22x128xbf16> to vector<1x16x128xbf16>
    %4 = vector.extract_strided_slice %1 {offsets = [0, 2, 0], sizes = [1, 16, 128], strides = [1, 1, 1]} : vector<1x22x128xbf16> to vector<1x16x128xbf16>
    %5 = vector.extract_strided_slice %1 {offsets = [0, 3, 0], sizes = [1, 16, 128], strides = [1, 1, 1]} : vector<1x22x128xbf16> to vector<1x16x128xbf16>
    %6 = vector.extract_strided_slice %1 {offsets = [0, 4, 0], sizes = [1, 16, 128], strides = [1, 1, 1]} : vector<1x22x128xbf16> to vector<1x16x128xbf16>
    %7 = vector.extract_strided_slice %1 {offsets = [0, 5, 0], sizes = [1, 16, 128], strides = [1, 1, 1]} : vector<1x22x128xbf16> to vector<1x16x128xbf16>
    %8 = vector.extract_strided_slice %1 {offsets = [0, 6, 0], sizes = [1, 16, 128], strides = [1, 1, 1]} : vector<1x22x128xbf16> to vector<1x16x128xbf16>
    %9 = tpu.concatenate %2, %3, %4, %5, %6, %7, %8 in 2 : vector<1x16x128xbf16>, vector<1x16x128xbf16>, vector<1x16x128xbf16>, vector<1x16x128xbf16>, vector<1x16x128xbf16>, vector<1x16x128xbf16>, vector<1x16x128xbf16> -> vector<1x16x896xbf16>
    %10 = vector.shape_cast %9 : vector<1x16x896xbf16> to vector<16x896xbf16>
    %c0_2 = arith.constant 0 : index
    %c0_3 = arith.constant 0 : index
    %11 = vector.load %arg3[%c0_2, %c0_3] : memref<896x128xbf16, #tpu.memory_space<vmem>>, vector<896x128xbf16>
    %cst = arith.constant dense<0.000000e+00> : vector<16x128xf32>
    %12 = tpu.matmul %10, %11, %cst {dimension_numbers = #tpu.dot_dimension_numbers<[1], [0], [0], [1], [0, 0, 1, 1], [], []>} : vector<16x896xbf16>, vector<896x128xbf16>, vector<16x128xf32> -> vector<16x128xf32>
    %13 = vector.shape_cast %12 : vector<16x128xf32> to vector<1x16x128xf32>
    %cst_4 = arith.constant 0.000000e+00 : f32
    %14 = vector.broadcast %cst_4 : f32 to vector<1x16x128xf32>
    %15 = arith.maximumf %13, %14 : vector<1x16x128xf32>
    %16 = arith.truncf %15 : vector<1x16x128xf32> to vector<1x16x128xbf16>
    %17 = vector.extract_strided_slice %16 {offsets = [0, 0, 0], sizes = [1, 12, 128], strides = [1, 1, 1]} : vector<1x16x128xbf16> to vector<1x12x128xbf16>
    %18 = vector.extract_strided_slice %16 {offsets = [0, 1, 0], sizes = [1, 12, 128], strides = [1, 1, 1]} : vector<1x16x128xbf16> to vector<1x12x128xbf16>
    %19 = vector.extract_strided_slice %16 {offsets = [0, 2, 0], sizes = [1, 12, 128], strides = [1, 1, 1]} : vector<1x16x128xbf16> to vector<1x12x128xbf16>
    %20 = vector.extract_strided_slice %16 {offsets = [0, 3, 0], sizes = [1, 12, 128], strides = [1, 1, 1]} : vector<1x16x128xbf16> to vector<1x12x128xbf16>
    %21 = vector.extract_strided_slice %16 {offsets = [0, 4, 0], sizes = [1, 12, 128], strides = [1, 1, 1]} : vector<1x16x128xbf16> to vector<1x12x128xbf16>
    %22 = tpu.concatenate %17, %18, %19, %20, %21 in 2 : vector<1x12x128xbf16>, vector<1x12x128xbf16>, vector<1x12x128xbf16>, vector<1x12x128xbf16>, vector<1x12x128xbf16> -> vector<1x12x640xbf16>
    %23 = vector.shape_cast %22 : vector<1x12x640xbf16> to vector<12x640xbf16>
    %c0_5 = arith.constant 0 : index
    %c0_6 = arith.constant 0 : index
    %24 = vector.load %arg4[%c0_5, %c0_6] : memref<640x128xbf16, #tpu.memory_space<vmem>>, vector<640x128xbf16>
    %cst_7 = arith.constant dense<0.000000e+00> : vector<12x128xf32>
    %25 = tpu.matmul %23, %24, %cst_7 {dimension_numbers = #tpu.dot_dimension_numbers<[1], [0], [0], [1], [0, 0, 1, 1], [], []>} : vector<12x640xbf16>, vector<640x128xbf16>, vector<12x128xf32> -> vector<12x128xf32>
    %26 = vector.shape_cast %25 : vector<12x128xf32> to vector<1x12x128xf32>
    %cst_8 = arith.constant 0.000000e+00 : f32
    %27 = vector.broadcast %cst_8 : f32 to vector<1x12x128xf32>
    %28 = arith.maximumf %26, %27 : vector<1x12x128xf32>
    %29 = arith.truncf %28 : vector<1x12x128xf32> to vector<1x12x128xbf16>
    %30 = vector.extract_strided_slice %29 {offsets = [0, 0, 0], sizes = [1, 10, 128], strides = [1, 1, 1]} : vector<1x12x128xbf16> to vector<1x10x128xbf16>
    %31 = vector.extract_strided_slice %29 {offsets = [0, 1, 0], sizes = [1, 10, 128], strides = [1, 1, 1]} : vector<1x12x128xbf16> to vector<1x10x128xbf16>
    %32 = vector.extract_strided_slice %29 {offsets = [0, 2, 0], sizes = [1, 10, 128], strides = [1, 1, 1]} : vector<1x12x128xbf16> to vector<1x10x128xbf16>
    %33 = tpu.concatenate %30, %31, %32 in 2 : vector<1x10x128xbf16>, vector<1x10x128xbf16>, vector<1x10x128xbf16> -> vector<1x10x384xbf16>
    %34 = vector.shape_cast %33 : vector<1x10x384xbf16> to vector<10x384xbf16>
    %c0_9 = arith.constant 0 : index
    %c0_10 = arith.constant 0 : index
    %35 = vector.load %arg5[%c0_9, %c0_10] : memref<384x128xbf16, #tpu.memory_space<vmem>>, vector<384x128xbf16>
    %cst_11 = arith.constant dense<0.000000e+00> : vector<10x128xf32>
    %36 = tpu.matmul %34, %35, %cst_11 {dimension_numbers = #tpu.dot_dimension_numbers<[1], [0], [0], [1], [0, 0, 1, 1], [], []>} : vector<10x384xbf16>, vector<384x128xbf16>, vector<10x128xf32> -> vector<10x128xf32>
    %37 = vector.shape_cast %36 : vector<10x128xf32> to vector<1x10x128xf32>
    %cst_12 = arith.constant 0.000000e+00 : f32
    %38 = vector.broadcast %cst_12 : f32 to vector<1x10x128xf32>
    %39 = arith.maximumf %37, %38 : vector<1x10x128xf32>
    %40 = arith.truncf %39 : vector<1x10x128xf32> to vector<1x10x128xbf16>
    %41 = vector.extract_strided_slice %40 {offsets = [0, 0, 0], sizes = [1, 8, 128], strides = [1, 1, 1]} : vector<1x10x128xbf16> to vector<1x8x128xbf16>
    %42 = vector.extract_strided_slice %40 {offsets = [0, 1, 0], sizes = [1, 8, 128], strides = [1, 1, 1]} : vector<1x10x128xbf16> to vector<1x8x128xbf16>
    %43 = vector.extract_strided_slice %40 {offsets = [0, 2, 0], sizes = [1, 8, 128], strides = [1, 1, 1]} : vector<1x10x128xbf16> to vector<1x8x128xbf16>
    %44 = tpu.concatenate %41, %42, %43 in 2 : vector<1x8x128xbf16>, vector<1x8x128xbf16>, vector<1x8x128xbf16> -> vector<1x8x384xbf16>
    %45 = vector.shape_cast %44 : vector<1x8x384xbf16> to vector<8x384xbf16>
    %c0_13 = arith.constant 0 : index
    %c0_14 = arith.constant 0 : index
    %46 = vector.load %arg6[%c0_13, %c0_14] : memref<384x128xbf16, #tpu.memory_space<vmem>>, vector<384x128xbf16>
    %cst_15 = arith.constant dense<0.000000e+00> : vector<8x128xf32>
    %47 = tpu.matmul %45, %46, %cst_15 {dimension_numbers = #tpu.dot_dimension_numbers<[1], [0], [0], [1], [0, 0, 1, 1], [], []>} : vector<8x384xbf16>, vector<384x128xbf16>, vector<8x128xf32> -> vector<8x128xf32>
    %48 = vector.shape_cast %47 : vector<8x128xf32> to vector<1x8x128xf32>
    %c0_16 = arith.constant 0 : index
    %c0_17 = arith.constant 0 : index
    %c0_18 = arith.constant 0 : index
    %49 = vector.load %arg1[%c0_16, %c0_17, %c0_18] : memref<1x8x128xf32, #tpu.memory_space<vmem>>, vector<1x8x128xf32>
    %50 = arith.mulf %49, %48 : vector<1x8x128xf32>
    %51 = arith.addf %50, %48 : vector<1x8x128xf32>
    %c0_19 = arith.constant 0 : index
    %c0_20 = arith.constant 0 : index
    %c0_21 = arith.constant 0 : index
    %52 = vector.load %arg7[%c0_19, %c0_20, %c0_21] : memref<1x8x128xf32, #tpu.memory_space<vmem>>, vector<1x8x128xf32>
    tpu.vector_store %arg7[%c0_19, %c0_20, %c0_21], %51 {strides = array<i32>} : memref<1x8x128xf32, #tpu.memory_space<vmem>>, vector<1x8x128xf32>,
    return
  }
  func.func @transform_0(%arg0: i32) -> (i32, i32, i32) {
    %c0_i32 = arith.constant 0 : i32
    %c0_i32_0 = arith.constant 0 : i32
    %c0_i32_1 = arith.constant 0 : i32
    return %arg0, %c0_i32, %c0_i32_0 : i32, i32, i32
  }
  func.func @transform_1(%arg0: i32) -> (i32, i32, i32) {
    %c0_i32 = arith.constant 0 : i32
    %c0_i32_0 = arith.constant 0 : i32
    %c0_i32_1 = arith.constant 0 : i32
    return %arg0, %c0_i32, %c0_i32_0 : i32, i32, i32
  }
  func.func @transform_2(%arg0: i32) -> (i32, i32) {
    %c0_i32 = arith.constant 0 : i32
    %c0_i32_0 = arith.constant 0 : i32
    %c0_i32_1 = arith.constant 0 : i32
    return %c0_i32, %c0_i32_0 : i32, i32
  }
  func.func @transform_3(%arg0: i32) -> (i32, i32) {
    %c0_i32 = arith.constant 0 : i32
    %c0_i32_0 = arith.constant 0 : i32
    %c0_i32_1 = arith.constant 0 : i32
    return %c0_i32, %c0_i32_0 : i32, i32
  }
  func.func @transform_4(%arg0: i32) -> (i32, i32) {
    %c0_i32 = arith.constant 0 : i32
    %c0_i32_0 = arith.constant 0 : i32
    %c0_i32_1 = arith.constant 0 : i32
    return %c0_i32, %c0_i32_0 : i32, i32
  }
  func.func @transform_5(%arg0: i32) -> (i32, i32) {
    %c0_i32 = arith.constant 0 : i32
    %c0_i32_0 = arith.constant 0 : i32
    %c0_i32_1 = arith.constant 0 : i32
    return %c0_i32, %c0_i32_0 : i32, i32
  }
  func.func @transform_6(%arg0: i32) -> (i32, i32, i32) {
    %c0_i32 = arith.constant 0 : i32
    %c0_i32_0 = arith.constant 0 : i32
    %c0_i32_1 = arith.constant 0 : i32
    return %arg0, %c0_i32, %c0_i32_0 : i32, i32, i32
  }
}

</mosaic_0001>

<bundles_post_ra>
// kernel: forward.1
= control target key start
LH: loop header
LB: loop body
LE: loop exit
PB: predicated region body
PF: predicated region fallthrough
CT: control target
= control target key end

     0   :  { %11 = vsyncpa [#allocation3], 0  ;;  %s3227_s0 = inlined_call_operand.vmem [shape: f32[2,8,128], index: 0, kind: input, shape index: {}]   ;;  %s3228_s1 = inlined_call_operand.vmem [shape: f32[2,22,128], index: 1, kind: input, shape index: {}]   ;;  %s3229_s2 = inlined_call_operand.vmem [shape: bf16[896,128], index: 2, kind: input, shape index: {}]   ;;  %s3230_s3 = inlined_call_operand.vmem [shape: bf16[640,128], index: 3, kind: input, shape index: {}]   ;;  %s3231_s4 = inlined_call_operand.hbm [shape: bf16[384,128], index: 4, kind: input, shape index: {}]   ;;  %s3232_s5 = inlined_call_operand.hbm [shape: bf16[384,128], index: 5, kind: input, shape index: {}]   ;;  %s3233_s6 = inlined_call_operand.vmem [shape: f32[2,8,128], index: 6, kind: output, shape index: {}]  }
   0x1   :  { %12 = vsyncpa [#allocation5], 0  ;;  %s2809_s21 = smov 0  }
   0x2 LB: > { %s2815_s22 = sadd.s32 4294967295, %s2766_s21   ;;  %p2096_p0 = scmp.ge.s32.totalorder %s2766_s21, 1  ;;  %s2766_s21 = sphi %s2809_s21, %s18_s21  }
   0x3   : > { %p185_p1 = scmp.lt.s32.totalorder %s2766_s21, 3  ;;  %s2768_s23 = smov [#allocation2]  }
   0x4   : > { %s203_s24 = sshll.u32 %s2768_s23, 4  ;;  %p2538_p3 = scmp.eq.s32.totalorder %s2815_s22, 0  ;;  %s204_s24 = int_to_ptr.vmem [resolvable:$true] %s203_s24 }
   0x5   : > { %p2819_p2 = pnand %p2096_p0, %p185_p1  ;;  %s2769_s26 = smov [#allocation4]  }
   0x6   : > { %s216_s27 = sshll.u32 %s2769_s26, 4  ;;  %s2711_s29 = scalar_lea.vmem %s204_s24, 3072  ;;  %s217_s27 = int_to_ptr.vmem [resolvable:$true] %s216_s27 }
   0x7   : > { %p2531_p4 = pneg %p2819_p2  ;;  %p2712_p7 = scmp.ne.s32.totalorder %s204_s24, %s2711_s29 }
   0x8   : > { %p2719_p10 = scmp.lt.s32.totalorder %s204_s24, %s204_s24  ;;  %p2720_p11 = scmp.lt.s32.totalorder %s2711_s29, %s2711_s29 }
   0x9   : > { %p2828_p5 = pnand %p2538_p3, %p2531_p4 }
   0xa   : > { %p2721_p12 = por %p2720_p11, %p2719_p10 }
   0xb   : > { %p2702_p6 = pneg %p2828_p5 }
   0xd   : > { %p2714_p8 = pnand %p2712_p7, %p2702_p6 }
   0xf   : > { %p2715_p9 = pneg %p2714_p8 }
  0x11   : > { %p2722_p13 = pnand %p2721_p12, %p2715_p9 }
  0x13   : > { %2725 = shalt.err (!%p2722_p13)
}
  0x14   : > { %s2770_s30 = smov 64   ;;  %s2771_s7 = smov 4  }
  0x15   : > { %2534 = dma.hbm_to_vmem [thread:$0]  (!%p2828_p5), %s3231_s4, 3072, %s204_s24, [#allocation3], %s2770_s30, %s2770_s30, %s2771_s7  }
  0x16   : > { %s2737_s10 = scalar_lea.vmem %s217_s27, 3072  ;;  %p2745_p7 = scmp.lt.s32.totalorder %s217_s27, %s217_s27 }
  0x17   : > { %p2738_p0 = scmp.ne.s32.totalorder %s217_s27, %s2737_s10  ;;  %p2746_p8 = scmp.lt.s32.totalorder %s2737_s10, %s2737_s10 }
  0x19   : > { %p2740_p1 = pnand %p2738_p0, %p2702_p6  ;;  %p2747_p10 = por %p2746_p8, %p2745_p7 }
  0x1b   : > { %p2741_p4 = pneg %p2740_p1 }
  0x1d   : > { %p2748_p9 = pnand %p2747_p10, %p2741_p4 }
  0x1f   : > { %2751 = shalt.err (!%p2748_p9)
}
  0x20   : > { %2537 = dma.hbm_to_vmem [thread:$0]  (!%p2828_p5), %s3232_s5, 3072, %s217_s27, [#allocation5], %s2770_s30, %s2770_s30, %s2771_s7  }
  0x21   : > { %247 = sbr.rel (%p2819_p2) target bundleno = 983 (0x3d7), region = 44 }
  0x26   : > { %2757 = dma.done.wait (%p2538_p3), [#allocation3], 3072  }
  0x27   : > { %2759 = vsyncadd (%p2538_p3), [#allocation3], 4294964224 }
  0x28   : > { %2761 = dma.done.wait (%p2538_p3), [#allocation5], 3072  }
  0x29   : > { %2763 = vsyncadd (%p2538_p3), [#allocation5], 4294964224  ;;  %v2556_v0 = vld [vmem:[%s3229_s2 + $0x78] sm:$0xff]   ;;  %v2560_v4 = vld [vmem:[%s3229_s2 + $0x70] sm:$0xff]   ;;  %p284_p2 = scmp.lt.s32.totalorder %s2815_s22, 1  ;;  %vm319_vm1 = vcmask 1046528  }
  0x2a   : > { %v2557_v1 = vld [vmem:[%s3229_s2 + $0xf8] sm:$0xff]   ;;  %2252 = vmatprep.subr.bf16.mxu0 %v2556_v0  ;;  %v2561_v5 = vld [vmem:[%s3229_s2 + $0xf0] sm:$0xff]   ;;  %v2564_v8 = vld [vmem:[%s3229_s2 + $0x68] sm:$0xff]   ;;  %vm303_vm0 = vsmask.f32 7424  ;;  %v2772_v38 = vmov 0.0  }
  0x2b   : > { %v2558_v2 = vld [vmem:[%s3229_s2 + $0x38] sm:$0xff]   ;;  %2274 = vmatprep.subr.bf16.mxu1 %v2557_v1  ;;  %v2562_v6 = vld [vmem:[%s3229_s2 + $0x30] sm:$0xff]   ;;  %v2565_v9 = vld [vmem:[%s3229_s2 + $0xe8] sm:$0xff]   ;;  %s3237_s22 = smov (!%p284_p2, %s2815_s22), 1  ;;  %vm324_vm2 = vsmask.f32 6400 }
  0x2c   : > { %v2559_v3 = vld [vmem:[%s3229_s2 + $0xb8] sm:$0xff]   ;;  %2253 = vmatpush3.bf16.msra.mxu0 %v2558_v2  ;;  %v2563_v7 = vld [vmem:[%s3229_s2 + $0xb0] sm:$0xff]   ;;  %v2566_v10 = vld [vmem:[%s3229_s2 + $0x28] sm:$0xff]   ;;  %s2522_s23 = smul.u32 24, %s3237_s22  ;;  %vm340_vm3 = vsmask.f32 5376 }
  0x2d   : > { %2275 = vmatpush3.bf16.msra.mxu1 %v2559_v3  ;;  %2254 = vmatprep.subr.bf16.mxu0 %v2560_v4  ;;  %v2567_v11 = vld [vmem:[%s3229_s2 + $0xa8] sm:$0xff]   ;;  %v2568_v12 = vld [vmem:[%s3229_s2 + $0x60] sm:$0xff]   ;;  %v2572_v16 = vld [vmem:[%s3229_s2 + $0x58] sm:$0xff]   ;;  %vm2773_vm4 = vmmov 0   ;;  %vm335_vm5 = vcmask 1045504   ;;  %vm349_vm6 = vcmask 1044480  }
  0x2e   : > { %2276 = vmatprep.subr.bf16.mxu1 %v2561_v5  ;;  %v2569_v13 = vld [vmem:[%s3229_s2 + $0xe0] sm:$0xff]   ;;  %v2573_v17 = vld [vmem:[%s3229_s2 + $0xd8] sm:$0xff]   ;;  %v2576_v20 = vld [vmem:[%s3229_s2 + $0x50] sm:$0xff]   ;;  %s292_s10 = scalar_lea.vmem %s3228_s1, %s2522_s23  ;;  %s2103_s11 = sshll.u32 %s3237_s22, 3 }
  0x2f   : > { %v2570_v14 = vld [vmem:[%s3229_s2 + $0x20] sm:$0xff]   ;;  %v2574_v18 = vld [vmem:[%s3229_s2 + $0x18] sm:$0xff]   ;;  %v2577_v21 = vld [vmem:[%s3229_s2 + $0xd0] sm:$0xff]   ;;  %s287_s14 = scalar_lea.vmem %s3227_s0, %s2103_s11  ;;  %s296_s17 = scalar_lea.vmem %s3233_s6, %s2103_s11 }
  0x30   : > { %2255 = vmatpush3.bf16.msra.mxu0 %v2562_v6  ;;  %v2571_v15 = vld [vmem:[%s3229_s2 + $0xa0] sm:$0xff]   ;;  %v2575_v19 = vld [vmem:[%s3229_s2 + $0x98] sm:$0xff]   ;;  %v2578_v22 = vld [vmem:[%s3229_s2 + $0x10] sm:$0xff]  }
  0x31   : > { %2277 = vmatpush3.bf16.msra.mxu1 %v2563_v7  ;;  %2256 = vmatprep.subr.bf16.mxu0 %v2564_v8  ;;  %v2579_v23 = vld [vmem:[%s3229_s2 + $0x90] sm:$0xff]   ;;  %v2580_v24 = vld [vmem:[%s3229_s2 + $0x48] sm:$0xff]   ;;  %v2584_v28 = vld [vmem:[%s3229_s2 + $0x40] sm:$0xff]  }
  0x32   : > { %2278 = vmatprep.subr.bf16.mxu1 %v2565_v9  ;;  %v2581_v25 = vld [vmem:[%s3229_s2 + $0xc8] sm:$0xff]   ;;  %v2585_v29 = vld [vmem:[%s3229_s2 + $0xc0] sm:$0xff]   ;;  %v300_v34 = vld [vmem:[%s292_s10 + $0x10] sm:$0x3f] }
  0x33   : > { %v2582_v26 = vld [vmem:[%s3229_s2 + $0x8] sm:$0xff]   ;;  %v2586_v30 = vld [vmem:[%s3229_s2] sm:$0xff]   ;;  %v2966_v36 = vpack.c.bf16 %v300_v34, %v300_v34  ;;  %v2588_v37 = vld [vmem:[%s3229_s2 + $0x178] sm:$0xff]  }
  0x34   : > { %2257 = vmatpush3.bf16.msra.mxu0 %v2566_v10  ;;  %v2583_v27 = vld [vmem:[%s3229_s2 + $0x88] sm:$0xff]   ;;  %v2587_v31 = vld [vmem:[%s3229_s2 + $0x80] sm:$0xff]   ;;  %v2589_v53 = vld [vmem:[%s3229_s2 + $0x138] sm:$0xff]  }
  0x35   : > { %2279 = vmatpush3.bf16.msra.mxu1 %v2567_v11  ;;  %2258 = vmatprep.subr.bf16.mxu0 %v2568_v12  ;;  %v298_v32 = vld [vmem:[%s292_s10] sm:$0xff]  ;;  %v299_v33 = vld [vmem:[%s292_s10 + $0x8] sm:$0xff]  ;;  %v312_v41 = vshll.u32 %v2966_v36, 16  ;;  %v328_v42 = vshrl.u32 %v2966_v36, 16  ;;  %v321_v44 = vrot.slane %v2966_v36, 1  ;;  %v2590_v56 = vld [vmem:[%s3229_s2 + $0x1b8] sm:$0xff]  }
  0x36   : > { %2280 = vmatprep.subr.bf16.mxu1 %v2569_v13  ;;  %v2964_v35 = vpack.c.bf16 %v299_v33, %v298_v32  ;;  %v2591_v60 = vld [vmem:[%s3229_s2 + $0x170] sm:$0xff]   ;;  %v2594_v4 = vld [vmem:[%s3229_s2 + $0x168] sm:$0xff]   ;;  %v2597_v8 = vld [vmem:[%s3229_s2 + $0x160] sm:$0xff]  }
  0x37   : > { %v314_v46 = vrot.slane %v312_v41, 1  ;;  %v330_v49 = vrot.slane %v328_v42, 1  ;;  %v331_v50 = vrot.slane %v312_v41, 2  ;;  %v344_v61 = vrot.slane %v328_v42, 2  ;;  %v2592_v1 = vld [vmem:[%s3229_s2 + $0x130] sm:$0xff]   ;;  %v2595_v6 = vld [vmem:[%s3229_s2 + $0x128] sm:$0xff]  }
  0x38   : > { %2259 = vmatpush3.bf16.msra.mxu0 %v2570_v14  ;;  %v305_v39 = vshrl.u32 %v2964_v35, 16  ;;  %v307_v40 = vshll.u32 %v2964_v35, 16  ;;  %v320_v43 = vrot.slane %v2964_v35, 1  ;;  %v345_v0 = vrot.slane %v312_v41, 3  ;;  %v2593_v2 = vld [vmem:[%s3229_s2 + $0x1b0] sm:$0xff]   ;;  %v2596_v7 = vld [vmem:[%s3229_s2 + $0x1a8] sm:$0xff]  }
  0x39   : > { %2281 = vmatpush3.bf16.msra.mxu1 %v2571_v15  ;;  %2260 = vmatprep.subr.bf16.mxu0 %v2572_v16  ;;  %v332_v55 = vor.u32 %v331_v50, %v330_v49  ;;  %v2598_v9 = vld [vmem:[%s3229_s2 + $0x120] sm:$0xff]   ;;  %v2600_v11 = vld [vmem:[%s3229_s2 + $0x158] sm:$0xff]   ;;  %v336_v13 = vrot.slane %v2964_v35, 2  ;;  %v337_v15 = vrot.slane %v2966_v36, 2  ;;  %v2603_v16 = vld [vmem:[%s3229_s2 + $0x150] sm:$0xff]  }
  0x3a   : > { %2282 = vmatprep.subr.bf16.mxu1 %v2573_v17  ;;  %v309_v45 = vrot.slane %v307_v40, 1  ;;  %v325_v47 = vrot.slane %v305_v39, 1  ;;  %v326_v48 = vrot.slane %v307_v40, 2  ;;  %v341_v54 = vrot.slane %v305_v39, 2  ;;  %v2599_v10 = vld [vmem:[%s3229_s2 + $0x1a0] sm:$0xff]   ;;  %v2601_v12 = vld [vmem:[%s3229_s2 + $0x118] sm:$0xff]  }
  0x3b   : > { %v342_v57 = vrot.slane %v307_v40, 3  ;;  %v322_v59 = vsel %vm319_vm1, %v320_v43, %v321_v44  ;;  %v346_v3 = vor.u32 %v345_v0, %v344_v61  ;;  %v2602_v14 = vld [vmem:[%s3229_s2 + $0x198] sm:$0xff]   ;;  %v350_v17 = vrot.slane %v2964_v35, 3  ;;  %v2616_v33 = vld [vmem:[%s3230_s3 + $0x70] sm:$0xff]   ;;  %v2622_v40 = vld [vmem:[%s3230_s3 + $0xe8] sm:$0xff]  }
  0x3c   : > { %2261 = vmatpush3.bf16.msra.mxu0 %v2574_v18  ;;  %v310_v51 = vor.u32 %v309_v45, %v305_v39  ;;  %v327_v52 = vor.u32 %v326_v48, %v325_v47  ;;  %v2604_v18 = vld [vmem:[%s3229_s2 + $0x110] sm:$0xff]   ;;  %v2615_v32 = vld [vmem:[%s3230_s3 + $0xb8] sm:$0xff]   ;;  %v2621_v39 = vld [vmem:[%s3230_s3 + $0x28] sm:$0xff]  }
  0x3d   : > { %2283 = vmatpush3.bf16.msra.mxu1 %v2575_v19  ;;  %2262 = vmatprep.subr.bf16.mxu0 %v2576_v20  ;;  %v343_v63 = vor.u32 %v342_v57, %v341_v54  ;;  %v351_v19 = vrot.slane %v2966_v36, 3  ;;  %v2605_v20 = vld [vmem:[%s3229_s2 + $0x190] sm:$0xff]   ;;  %v2623_v41 = vld [vmem:[%s3230_s3 + $0xa8] sm:$0xff]   ;;  %v2624_v42 = vld [vmem:[%s3230_s3 + $0x60] sm:$0xff]  }
  0x3e   : > { %2284 = vmatprep.subr.bf16.mxu1 %v2577_v21  ;;  %v315_v58 = vsel %vm303_vm0, %v310_v51, %v314_v46  ;;  %v333_v62 = vsel %vm324_vm2, %v327_v52, %v332_v55  ;;  %v2606_v21 = vld [vmem:[%s3229_s2 + $0x148] sm:$0xff]   ;;  %v2618_v34 = vld [vmem:[%s3230_s3 + $0xf0] sm:$0xff]   ;;  %v2625_v43 = vld [vmem:[%s3230_s3 + $0x20] sm:$0xff]  }
  0x3f   : > { %834 = vmatprep.mubr.bf16.mxu0 %v315_v58  ;;  %875 = vmatprep.mubr.bf16.mxu1 %v333_v62  ;;  %v347_v5 = vsel %vm340_vm3, %v343_v63, %v346_v3  ;;  %v2619_v36 = vld [vmem:[%s3230_s3 + $0xb0] sm:$0xff]   ;;  %v2626_v44 = vld [vmem:[%s3230_s3 + $0xe0] sm:$0xff]   ;;  %v2628_v46 = vld [vmem:[%s3230_s3 + $0x58] sm:$0xff]  }
  0x40   : > { %2263 = vmatpush3.bf16.msra.mxu0 %v2578_v22  ;;  %v2607_v22 = vld [vmem:[%s3229_s2 + $0x108] sm:$0xff]   ;;  %v2627_v45 = vld [vmem:[%s3230_s3 + $0xa0] sm:$0xff]   ;;  %v2629_v47 = vld [vmem:[%s3230_s3 + $0x18] sm:$0xff]  }
  0x41   : > { %2285 = vmatpush3.bf16.msra.mxu1 %v2579_v23  ;;  %2264 = vmatprep.subr.bf16.mxu0 %v2580_v24  ;;  %v2608_v23 = vld [vmem:[%s3229_s2 + $0x188] sm:$0xff]   ;;  %v2609_v24 = vld [vmem:[%s3229_s2 + $0x140] sm:$0xff]   ;;  %v2630_v48 = vld [vmem:[%s3230_s3 + $0xd8] sm:$0xff]  }
  0x42   : > { %2286 = vmatprep.subr.bf16.mxu1 %v2581_v25  ;;  %v2610_v25 = vld [vmem:[%s3229_s2 + $0x100] sm:$0xff]   ;;  %v2631_v49 = vld [vmem:[%s3230_s3 + $0x98] sm:$0xff]   ;;  %v2632_v50 = vld [vmem:[%s3230_s3 + $0x50] sm:$0xff]  }
  0x43   : > { %v2633_v51 = vld [vmem:[%s3230_s3 + $0x10] sm:$0xff]   ;;  %v2636_v54 = vld [vmem:[%s3230_s3 + $0x48] sm:$0xff]   ;;  %v2640_v58 = vld [vmem:[%s3230_s3 + $0x40] sm:$0xff]  }
  0x44   : > { %2265 = vmatpush3.bf16.msra.mxu0 %v2582_v26  ;;  %v2611_v26 = vld [vmem:[%s3229_s2 + $0x180] sm:$0xff]   ;;  %v2634_v52 = vld [vmem:[%s3230_s3 + $0xd0] sm:$0xff]   ;;  %v2637_v55 = vld [vmem:[%s3230_s3 + $0x8] sm:$0xff]  }
  0x45   : > { %2287 = vmatpush3.bf16.msra.mxu1 %v2583_v27  ;;  %2266 = vmatprep.subr.bf16.mxu0 %v2584_v28  ;;  %v338_v27 = vsel %vm335_vm5, %v336_v13, %v337_v15  ;;  %v352_v28 = vsel %vm349_vm6, %v350_v17, %v351_v19  ;;  %v2639_v57 = vld [vmem:[%s3230_s3 + $0x88] sm:$0xff]   ;;  %v2643_v61 = vld [vmem:[%s3230_s3 + $0x80] sm:$0xff]  }
  0x46   : > { %2288 = vmatprep.subr.bf16.mxu1 %v2585_v29  ;;  %v2612_v29 = vld [vmem:[%s3230_s3 + $0x78] sm:$0xff]  }
  0x48   : > { %2267 = vmatpush3.bf16.msra.mxu0 %v2586_v30  ;;  %v2613_v30 = vld [vmem:[%s3230_s3 + $0x38] sm:$0xff]  }
  0x49   : > { %2289 = vmatpush3.bf16.msra.mxu1 %v2587_v31  ;;  %2296 = vmatprep.subr.bf16.mxu0 %v2588_v37  ;;  %v2614_v31 = vld [vmem:[%s3230_s3 + $0xf8] sm:$0xff]   ;;  %v2620_v37 = vld [vmem:[%s3230_s3 + $0x68] sm:$0xff]  }
  0x4a   : > { %2442 = vmatprep.subr.bf16.mxu1 %v2772_v38 }
  0x4b   : > { %835 = vmatmul.mubr.bf16.vlgmr.msra.gmra.mxu0 %v2964_v35  ;;  %v2617_v35 = vld [vmem:[%s3230_s3 + $0x30] sm:$0xff]  }
  0x4c   : > { %876 = vmatmul.mubr.bf16.vlgmr.msra.gmra.mxu1 %v322_v59  ;;  %2297 = vmatpush3.bf16.msra.mxu0 %v2589_v53  ;;  %v2635_v53 = vld [vmem:[%s3230_s3 + $0x90] sm:$0xff]   ;;  %v2642_v59 = vld [vmem:[%s3230_s3 + $0xc0] sm:$0xff]  }
  0x4d   : > { %2443 = vmatpush3.bf16.msra.mxu1 %v2590_v56  ;;  %2298 = vmatprep.subr.bf16.mxu0 %v2591_v60  ;;  %v2638_v56 = vld [vmem:[%s3230_s3 + $0xc8] sm:$0xff]   ;;  %v2641_v60 = vld [vmem:[%s3230_s3] sm:$0xff]  }
  0x4e   : > { %2444 = vmatprep.subr.bf16.mxu1 %v2772_v38  ;;  %2458 = vmatprep.mubr.msk.bf16.mxu1 %vm2773_vm4, %v2772_v38 }
  0x4f   : > { %916 = vmatprep.mubr.bf16.mxu0 %v347_v5 }
  0x50   : > { %2299 = vmatpush3.bf16.msra.mxu0 %v2592_v1 }
  0x51   : > { %2445 = vmatpush3.bf16.msra.mxu1 %v2593_v2  ;;  %2300 = vmatprep.subr.bf16.mxu0 %v2594_v4 }
  0x52   : > { %2446 = vmatprep.subr.bf16.mxu1 %v2772_v38 }
  0x54   : > { %2301 = vmatpush3.bf16.msra.mxu0 %v2595_v6 }
  0x55   : > { %2447 = vmatpush3.bf16.msra.mxu1 %v2596_v7  ;;  %2302 = vmatprep.subr.bf16.mxu0 %v2597_v8 }
  0x56   : > { %2448 = vmatprep.subr.bf16.mxu1 %v2772_v38 }
  0x58   : > { %2303 = vmatpush3.bf16.msra.mxu0 %v2598_v9 }
  0x59   : > { %2449 = vmatpush3.bf16.msra.mxu1 %v2599_v10  ;;  %2304 = vmatprep.subr.bf16.mxu0 %v2600_v11 }
  0x5a   : > { %2450 = vmatprep.subr.bf16.mxu1 %v2772_v38 }
  0x5c   : > { %2305 = vmatpush3.bf16.msra.mxu0 %v2601_v12 }
  0x5d   : > { %2451 = vmatpush3.bf16.msra.mxu1 %v2602_v14  ;;  %2306 = vmatprep.subr.bf16.mxu0 %v2603_v16 }
  0x5e   : > { %2452 = vmatprep.subr.bf16.mxu1 %v2772_v38 }
  0x60   : > { %2307 = vmatpush3.bf16.msra.mxu0 %v2604_v18 }
  0x61   : > { %2453 = vmatpush3.bf16.msra.mxu1 %v2605_v20  ;;  %2308 = vmatprep.subr.bf16.mxu0 %v2606_v21 }
  0x62   : > { %2454 = vmatprep.subr.bf16.mxu1 %v2772_v38 }
  0x64   : > { %2309 = vmatpush3.bf16.msra.mxu0 %v2607_v22 }
  0x65   : > { %2455 = vmatpush3.bf16.msra.mxu1 %v2608_v23  ;;  %2310 = vmatprep.subr.bf16.mxu0 %v2609_v24 }
  0x66   : > { %2456 = vmatprep.subr.bf16.mxu1 %v2772_v38 }
  0x68   : > { %2311 = vmatpush3.bf16.msra.mxu0 %v2610_v25 }
  0x69   : > { %2457 = vmatpush3.bf16.msra.mxu1 %v2611_v26  ;;  %2327 = vmatprep.subr.bf16.mxu0 %v2612_v29 }
  0x6a   : > { %2349 = vmatprep.subr.bf16.mxu1 %v2614_v31 }
  0x6b   : > { %917 = vmatmul.mubr.bf16.vlgmr.msra.gmra.mxu0 %v338_v27 }
  0x6c   : > { %2459 = vmatmul.mubr.bf16.vlgmr.msra.gmra.mxu1 %v352_v28  ;;  %2328 = vmatpush3.bf16.msra.mxu0 %v2613_v30 }
  0x6d   : > { %2350 = vmatpush3.bf16.msra.mxu1 %v2615_v32  ;;  %2329 = vmatprep.subr.bf16.mxu0 %v2616_v33 }
  0x6e   : > { %2351 = vmatprep.subr.bf16.mxu1 %v2618_v34 }
  0x70   : > { %2330 = vmatpush3.bf16.msra.mxu0 %v2617_v35 }
  0x71   : > { %2352 = vmatpush3.bf16.msra.mxu1 %v2619_v36  ;;  %2331 = vmatprep.subr.bf16.mxu0 %v2620_v37  ;;  %v2644_v36 = vld [vmem:[%s3230_s3 + $0x138] sm:$0xff]  }
  0x72   : > { %2353 = vmatprep.subr.bf16.mxu1 %v2622_v40  ;;  %v2646_v40 = vld [vmem:[%s3230_s3 + $0x128] sm:$0xff]  }
  0x74   : > { %2332 = vmatpush3.bf16.msra.mxu0 %v2621_v39  ;;  %v2645_v39 = vld [vmem:[%s3230_s3 + $0x130] sm:$0xff]  }
  0x75   : > { %2354 = vmatpush3.bf16.msra.mxu1 %v2623_v41  ;;  %2333 = vmatprep.subr.bf16.mxu0 %v2624_v42  ;;  %v2647_v41 = vld [vmem:[%s3230_s3 + $0x120] sm:$0xff]   ;;  %v2648_v42 = vld [vmem:[%s3230_s3 + $0x118] sm:$0xff]  }
  0x76   : > { %2355 = vmatprep.subr.bf16.mxu1 %v2626_v44  ;;  %v2650_v44 = vld [vmem:[%s3230_s3 + $0x108] sm:$0xff]  }
  0x78   : > { %2334 = vmatpush3.bf16.msra.mxu0 %v2625_v43  ;;  %v2649_v43 = vld [vmem:[%s3230_s3 + $0x110] sm:$0xff]  }
  0x79   : > { %2356 = vmatpush3.bf16.msra.mxu1 %v2627_v45  ;;  %2335 = vmatprep.subr.bf16.mxu0 %v2628_v46  ;;  %v2651_v45 = vld [vmem:[%s3230_s3 + $0x100] sm:$0xff]  }
  0x7a   : > { %2357 = vmatprep.subr.bf16.mxu1 %v2630_v48  ;;  %v2653_v48 = vld [vmem:[#allocation2 + $0x78] sm:$0xff]  }
  0x7c   : > { %2336 = vmatpush3.bf16.msra.mxu0 %v2629_v47  ;;  %v2652_v47 = vld [vmem:[#allocation2 + $0xb8] sm:$0xff]  }
  0x7d   : > { %2358 = vmatpush3.bf16.msra.mxu1 %v2631_v49  ;;  %2337 = vmatprep.subr.bf16.mxu0 %v2632_v50  ;;  %v2655_v49 = vld [vmem:[#allocation2 + $0x38] sm:$0xff]   ;;  %v2656_v50 = vld [vmem:[#allocation2 + $0x70] sm:$0xff]  }
  0x7e   : > { %2359 = vmatprep.subr.bf16.mxu1 %v2634_v52  ;;  %v2658_v52 = vld [vmem:[#allocation2 + $0x30] sm:$0xff]  }
  0x80   : > { %2338 = vmatpush3.bf16.msra.mxu0 %v2633_v51  ;;  %v2654_v51 = vld [vmem:[#allocation2 + $0xb0] sm:$0xff]  }
  0x81   : > { %2360 = vmatpush3.bf16.msra.mxu1 %v2635_v53  ;;  %2339 = vmatprep.subr.bf16.mxu0 %v2636_v54  ;;  %v2659_v53 = vld [vmem:[#allocation2 + $0x68] sm:$0xff]  }
  0x82   : > { %2361 = vmatprep.subr.bf16.mxu1 %v2638_v56  ;;  %v2657_v54 = vld [vmem:[#allocation2 + $0xa8] sm:$0xff]   ;;  %v2662_v56 = vld [vmem:[#allocation2 + $0x60] sm:$0xff]  }
  0x84   : > { %2340 = vmatpush3.bf16.msra.mxu0 %v2637_v55  ;;  %v2661_v55 = vld [vmem:[#allocation2 + $0x28] sm:$0xff]  }
  0x85   : > { %2362 = vmatpush3.bf16.msra.mxu1 %v2639_v57  ;;  %2341 = vmatprep.subr.bf16.mxu0 %v2640_v58  ;;  %v2660_v57 = vld [vmem:[#allocation2 + $0xa0] sm:$0xff]  }
  0x86   : > { %2363 = vmatprep.subr.bf16.mxu1 %v2642_v59  ;;  %v2664_v58 = vld [vmem:[#allocation2 + $0x20] sm:$0xff]   ;;  %v2663_v59 = vld [vmem:[#allocation2 + $0x98] sm:$0xff]  }
  0x88   : > { %2342 = vmatpush3.bf16.msra.mxu0 %v2641_v60  ;;  %v2665_v60 = vld [vmem:[#allocation2 + $0x58] sm:$0xff]  }
  0x89   : > { %2364 = vmatpush3.bf16.msra.mxu1 %v2643_v61  ;;  %2462 = vmatprep.subr.bf16.mxu0 %v2772_v38  ;;  %v2666_v61 = vld [vmem:[#allocation2 + $0x90] sm:$0xff]  }
  0x8a   : > { %2380 = vmatprep.subr.bf16.mxu1 %v2653_v48  ;;  %v2688_v48 = vld [vmem:[#allocation4 + $0x20] sm:$0xff]  }
 0x10b   : > { %v2268_v62 = vpop.f32.mrf.mxu0 }
 0x10c   : > { %v2290_v63 = vpop.f32.mrf.mxu1 }
 0x10d   : > { %v2269_v0 = vpop.f32.mrf.mxu0 }
 0x10e   : > { %v2291_v1 = vpop.f32.mrf.mxu1  ;;  %v2270_v5 = vadd.f32 %v2269_v0, %v2268_v62  ;;  %v2667_v62 = vld [vmem:[#allocation2 + $0x18] sm:$0xff]   ;;  %v2669_v0 = vld [vmem:[#allocation2 + $0x88] sm:$0xff]  }
 0x10f   : > { %v2271_v2 = vpop.f32.mrf.mxu0  ;;  %v2292_v6 = vadd.f32 %v2291_v1, %v2290_v63  ;;  %v2668_v63 = vld [vmem:[#allocation2 + $0x50] sm:$0xff]  }
 0x110   : > { %v2293_v3 = vpop.f32.mrf.mxu1  ;;  %v2670_v1 = vld [vmem:[#allocation2 + $0x10] sm:$0xff]  }
 0x111   : > { %v2272_v4 = vpop.f32.mrf.mxu0  ;;  %v878_v11 = vadd.f32 %v2292_v6, %v2270_v5  ;;  %v2674_v5 = vld [vmem:[#allocation2 + $0x40] sm:$0xff]  }
 0x112   : > { %v2294_v7 = vpop.f32.mrf.mxu1  ;;  %v2273_v12 = vadd.f32 %v2272_v4, %v2271_v2  ;;  %v2671_v2 = vld [vmem:[#allocation2 + $0x48] sm:$0xff]   ;;  %v2675_v6 = vld [vmem:[#allocation2] sm:$0xff]  }
 0x113   : > { %v2295_v13 = vadd.f32 %v2294_v7, %v2293_v3  ;;  %v2672_v3 = vld [vmem:[#allocation2 + $0x80] sm:$0xff]   ;;  %v2673_v4 = vld [vmem:[#allocation2 + $0x8] sm:$0xff]   ;;  %v2677_v7 = vld [vmem:[#allocation4 + $0x78] sm:$0xff]  }
 0x115   : > { %v881_v20 = vadd.f32 %v2295_v13, %v2273_v12 }
 0x12b   : > { %v2312_v8 = vpop.f32.mrf.mxu0 }
 0x12c   : > { %v959_v9 = vpop.f32.mrf.mxu1 }
 0x12d   : > { %v2313_v10 = vpop.f32.mrf.mxu0 }
 0x12e   : > { %v2314_v14 = vadd.f32 %v2313_v10, %v2312_v8  ;;  %v2460_v15 = vpop.f32.mrf.mxu1 }
 0x12f   : > { %v2315_v16 = vpop.f32.mrf.mxu0 }
 0x130   : > { %v919_v17 = vadd.f32 %v2314_v14, %v878_v11  ;;  %v962_v18 = vpop.f32.mrf.mxu1 }
 0x131   : > { %v2316_v19 = vpop.f32.mrf.mxu0 }
 0x132   : > { %v2317_v21 = vadd.f32 %v2316_v19, %v2315_v16  ;;  %v2461_v22 = vpop.f32.mrf.mxu1  ;;  %v960_v23 = vadd.f32 %v959_v9, %v919_v17 }
 0x134   : > { %v922_v24 = vadd.f32 %v2317_v21, %v881_v20  ;;  %v966_v26 = vmax.f32 %v960_v23, 0.0 }
 0x136   : > { %v963_v25 = vadd.f32 %v962_v18, %v922_v24 }
 0x138   : > { %v967_v27 = vmax.f32 %v963_v25, 0.0 }
 0x13a   : > { %v968_v28 = vpack.c.bf16 %v967_v27, %v966_v26 }
 0x13c   : > { %v970_v29 = vshrl.u32 %v968_v28, 16  ;;  %v972_v30 = vshll.u32 %v968_v28, 16  ;;  %v978_v37 = vrot.slane %v968_v28, 1  ;;  %v984_v46 = vrot.slane %v968_v28, 2 }
 0x13e   : > { %v974_v31 = vrot.slane %v972_v30, 1  ;;  %v980_v32 = vrot.slane %v970_v29, 1  ;;  %v981_v33 = vrot.slane %v972_v30, 2 }
 0x140   : > { %v975_v34 = vor.u32 %v974_v31, %v970_v29  ;;  %v982_v35 = vor.u32 %v981_v33, %v980_v32  ;;  %v2676_v31 = vld [vmem:[#allocation4 + $0xb8] sm:$0xff]  }
 0x142   : > { %1338 = vmatprep.mubr.bf16.mxu0 %v975_v34  ;;  %1379 = vmatprep.mubr.bf16.mxu1 %v982_v35 }
 0x143   : > { %1339 = vmatmul.mubr.bf16.vlgmr.msra.gmra.mxu0 %v968_v28  ;;  %1380 = vmatmul.mubr.bf16.vlgmr.msra.gmra.mxu1 %v978_v37 }
 0x144   : > { %2463 = vmatpush3.bf16.msra.mxu0 %v2644_v36  ;;  %2478 = vmatprep.mubr.msk.bf16.mxu0 %vm2773_vm4, %v2772_v38  ;;  %v2678_v36 = vld [vmem:[#allocation4 + $0xb0] sm:$0xff]  }
 0x145   : > { %2464 = vmatprep.subr.bf16.mxu0 %v2772_v38  ;;  %2381 = vmatpush3.bf16.msra.mxu1 %v2655_v49  ;;  %v2689_v49 = vld [vmem:[#allocation4 + $0x58] sm:$0xff]  }
 0x146   : > { %2382 = vmatprep.subr.bf16.mxu1 %v2656_v50  ;;  %v2690_v50 = vld [vmem:[#allocation4 + $0x90] sm:$0xff]  }
 0x148   : > { %2465 = vmatpush3.bf16.msra.mxu0 %v2645_v39  ;;  %v2679_v39 = vld [vmem:[#allocation4 + $0x38] sm:$0xff]  }
 0x149   : > { %2466 = vmatprep.subr.bf16.mxu0 %v2772_v38  ;;  %2383 = vmatpush3.bf16.msra.mxu1 %v2658_v52  ;;  %v2692_v52 = vld [vmem:[#allocation4 + $0x50] sm:$0xff]  }
 0x14a   : > { %2384 = vmatprep.subr.bf16.mxu1 %v2659_v53  ;;  %v2693_v53 = vld [vmem:[#allocation4 + $0x88] sm:$0xff]  }
 0x14c   : > { %2467 = vmatpush3.bf16.msra.mxu0 %v2646_v40  ;;  %v2680_v40 = vld [vmem:[#allocation4 + $0x70] sm:$0xff]  }
 0x14d   : > { %2468 = vmatprep.subr.bf16.mxu0 %v2772_v38  ;;  %2385 = vmatpush3.bf16.msra.mxu1 %v2661_v55  ;;  %v2695_v55 = vld [vmem:[#allocation4 + $0x48] sm:$0xff]  }
 0x14e   : > { %2386 = vmatprep.subr.bf16.mxu1 %v2662_v56  ;;  %v2696_v56 = vld [vmem:[#allocation4 + $0x80] sm:$0xff]  }
 0x150   : > { %2469 = vmatpush3.bf16.msra.mxu0 %v2647_v41  ;;  %v2681_v41 = vld [vmem:[#allocation4 + $0xa8] sm:$0xff]  }
 0x151   : > { %2470 = vmatprep.subr.bf16.mxu0 %v2772_v38  ;;  %2387 = vmatpush3.bf16.msra.mxu1 %v2664_v58  ;;  %v2698_v58 = vld [vmem:[#allocation4 + $0x40] sm:$0xff]  }
 0x152   : > { %2388 = vmatprep.subr.bf16.mxu1 %v2665_v60 }
 0x154   : > { %2471 = vmatpush3.bf16.msra.mxu0 %v2648_v42  ;;  %v2682_v42 = vld [vmem:[#allocation4 + $0x30] sm:$0xff]  }
 0x155   : > { %2472 = vmatprep.subr.bf16.mxu0 %v2772_v38  ;;  %2389 = vmatpush3.bf16.msra.mxu1 %v2667_v62 }
 0x156   : > { %2390 = vmatprep.subr.bf16.mxu1 %v2668_v63 }
 0x158   : > { %2473 = vmatpush3.bf16.msra.mxu0 %v2649_v43  ;;  %v2683_v43 = vld [vmem:[#allocation4 + $0x68] sm:$0xff]  }
 0x159   : > { %2474 = vmatprep.subr.bf16.mxu0 %v2772_v38  ;;  %2391 = vmatpush3.bf16.msra.mxu1 %v2670_v1 }
 0x15a   : > { %2392 = vmatprep.subr.bf16.mxu1 %v2671_v2 }
 0x15c   : > { %2475 = vmatpush3.bf16.msra.mxu0 %v2650_v44  ;;  %v2684_v44 = vld [vmem:[#allocation4 + $0xa0] sm:$0xff]  }
 0x15d   : > { %2476 = vmatprep.subr.bf16.mxu0 %v2772_v38  ;;  %2393 = vmatpush3.bf16.msra.mxu1 %v2673_v4 }
 0x15e   : > { %2394 = vmatprep.subr.bf16.mxu1 %v2674_v5 }
 0x160   : > { %2477 = vmatpush3.bf16.msra.mxu0 %v2651_v45  ;;  %v2685_v45 = vld [vmem:[#allocation4 + $0x28] sm:$0xff]  }
 0x161   : > { %2482 = vmatprep.subr.bf16.mxu0 %v2772_v38  ;;  %2395 = vmatpush3.bf16.msra.mxu1 %v2675_v6 }
 0x162   : > { %2411 = vmatprep.subr.bf16.mxu1 %v2677_v7 }
 0x163   : > { %2479 = vmatmul.mubr.bf16.vlgmr.msra.gmra.mxu0 %v984_v46  ;;  %v2686_v46 = vld [vmem:[#allocation4 + $0x60] sm:$0xff]  }
 0x164   : > { %2498 = vmatprep.mubr.msk.bf16.mxu0 %vm2773_vm4, %v2772_v38  ;;  %2483 = vmatpush3.bf16.msra.mxu0 %v2652_v47  ;;  %v2687_v47 = vld [vmem:[#allocation4 + $0x98] sm:$0xff]  }
 0x165   : > { %2484 = vmatprep.subr.bf16.mxu0 %v2772_v38 }
 0x168   : > { %2485 = vmatpush3.bf16.msra.mxu0 %v2654_v51  ;;  %v2691_v51 = vld [vmem:[#allocation4 + $0x18] sm:$0xff]  }
 0x169   : > { %2486 = vmatprep.subr.bf16.mxu0 %v2772_v38 }
 0x16c   : > { %2487 = vmatpush3.bf16.msra.mxu0 %v2657_v54  ;;  %v2694_v54 = vld [vmem:[#allocation4 + $0x10] sm:$0xff]  }
 0x16d   : > { %2488 = vmatprep.subr.bf16.mxu0 %v2772_v38 }
 0x170   : > { %2489 = vmatpush3.bf16.msra.mxu0 %v2660_v57  ;;  %v2697_v57 = vld [vmem:[#allocation4 + $0x8] sm:$0xff]  }
 0x171   : > { %2490 = vmatprep.subr.bf16.mxu0 %v2772_v38 }
 0x174   : > { %2491 = vmatpush3.bf16.msra.mxu0 %v2663_v59  ;;  %v2699_v59 = vld [vmem:[#allocation4] sm:$0xff]  }
 0x175   : > { %2492 = vmatprep.subr.bf16.mxu0 %v2772_v38 }
 0x178   : > { %2493 = vmatpush3.bf16.msra.mxu0 %v2666_v61 }
 0x179   : > { %2494 = vmatprep.subr.bf16.mxu0 %v2772_v38 }
 0x17c   : > { %2495 = vmatpush3.bf16.msra.mxu0 %v2669_v0 }
 0x17d   : > { %2496 = vmatprep.subr.bf16.mxu0 %v2772_v38 }
 0x180   : > { %2497 = vmatpush3.bf16.msra.mxu0 %v2672_v3 }
 0x181   : > { %2502 = vmatprep.subr.bf16.mxu0 %v2772_v38 }
 0x203   : > { %v2343_v8 = vpop.f32.mrf.mxu0  ;;  %v2365_v9 = vpop.f32.mrf.mxu1 }
 0x205   : > { %v2344_v10 = vpop.f32.mrf.mxu0  ;;  %v2366_v11 = vpop.f32.mrf.mxu1 }
 0x206   : > { %v2345_v16 = vadd.f32 %v2344_v10, %v2343_v8  ;;  %v2367_v17 = vadd.f32 %v2366_v11, %v2365_v9 }
 0x207   : > { %v2346_v12 = vpop.f32.mrf.mxu0  ;;  %v2368_v13 = vpop.f32.mrf.mxu1 }
 0x208   : > { %v1382_v21 = vadd.f32 %v2367_v17, %v2345_v16 }
 0x209   : > { %v2347_v14 = vpop.f32.mrf.mxu0  ;;  %v2369_v15 = vpop.f32.mrf.mxu1 }
 0x20a   : > { %v2348_v18 = vadd.f32 %v2347_v14, %v2346_v12  ;;  %v2370_v19 = vadd.f32 %v2369_v15, %v2368_v13 }
 0x20c   : > { %v1385_v24 = vadd.f32 %v2370_v19, %v2348_v18 }
 0x223   : > { %v1422_v20 = vpop.f32.mrf.mxu0 }
 0x224   : > { %v1423_v23 = vadd.f32 %v1422_v20, %v1382_v21 }
 0x225   : > { %v2480_v22 = vpop.f32.mrf.mxu0 }
 0x226   : > { %v1429_v28 = vmax.f32 %v1423_v23, 0.0  ;;  %v2003_v22 = vld [vmem:[%s287_s14] sm:$0xff] }
 0x227   : > { %v1425_v25 = vpop.f32.mrf.mxu0 }
 0x228   : > { %v1426_v26 = vadd.f32 %v1425_v25, %v1385_v24 }
 0x229   : > { %v2481_v27 = vpop.f32.mrf.mxu0 }
 0x22a   : > { %v1430_v29 = vmax.f32 %v1426_v26, 0.0 }
 0x22c   : > { %v1431_v30 = vpack.c.bf16 %v1430_v29, %v1429_v28 }
 0x22e   : > { %v1441_v32 = vrot.slane %v1431_v30, 1  ;;  %v1435_v33 = vshll.u32 %v1431_v30, 16  ;;  %v1433_v34 = vshrl.u32 %v1431_v30, 16 }
 0x230   : > { %2499 = vmatmul.mubr.bf16.vlgmr.msra.gmra.mxu0 %v1441_v32  ;;  %v1437_v35 = vrot.slane %v1435_v33, 1 }
 0x231   : > { %2503 = vmatpush3.bf16.msra.mxu0 %v2676_v31  ;;  %2518 = vmatprep.mubr.msk.bf16.mxu0 %vm2773_vm4, %v2772_v38 }
 0x232   : > { %v1438_v37 = vor.u32 %v1437_v35, %v1433_v34  ;;  %2504 = vmatprep.subr.bf16.mxu0 %v2772_v38 }
 0x234   : > { %1667 = vmatprep.mubr.bf16.mxu1 %v1438_v37 }
 0x235   : > { %1668 = vmatmul.mubr.bf16.vlgmr.msra.gmra.mxu1 %v1431_v30  ;;  %2505 = vmatpush3.bf16.msra.mxu0 %v2678_v36 }
 0x236   : > { %2412 = vmatpush3.bf16.msra.mxu1 %v2679_v39  ;;  %2506 = vmatprep.subr.bf16.mxu0 %v2772_v38 }
 0x237   : > { %2413 = vmatprep.subr.bf16.mxu1 %v2680_v40 }
 0x239   : > { %2507 = vmatpush3.bf16.msra.mxu0 %v2681_v41 }
 0x23a   : > { %2508 = vmatprep.subr.bf16.mxu0 %v2772_v38  ;;  %2414 = vmatpush3.bf16.msra.mxu1 %v2682_v42 }
 0x23b   : > { %2415 = vmatprep.subr.bf16.mxu1 %v2683_v43 }
 0x23d   : > { %2509 = vmatpush3.bf16.msra.mxu0 %v2684_v44 }
 0x23e   : > { %2416 = vmatpush3.bf16.msra.mxu1 %v2685_v45  ;;  %2510 = vmatprep.subr.bf16.mxu0 %v2772_v38 }
 0x23f   : > { %2417 = vmatprep.subr.bf16.mxu1 %v2686_v46 }
 0x241   : > { %2511 = vmatpush3.bf16.msra.mxu0 %v2687_v47 }
 0x242   : > { %2418 = vmatpush3.bf16.msra.mxu1 %v2688_v48  ;;  %2512 = vmatprep.subr.bf16.mxu0 %v2772_v38 }
 0x243   : > { %2419 = vmatprep.subr.bf16.mxu1 %v2689_v49 }
 0x245   : > { %2513 = vmatpush3.bf16.msra.mxu0 %v2690_v50 }
 0x246   : > { %2420 = vmatpush3.bf16.msra.mxu1 %v2691_v51  ;;  %2514 = vmatprep.subr.bf16.mxu0 %v2772_v38 }
 0x247   : > { %2421 = vmatprep.subr.bf16.mxu1 %v2692_v52 }
 0x249   : > { %2515 = vmatpush3.bf16.msra.mxu0 %v2693_v53 }
 0x24a   : > { %2422 = vmatpush3.bf16.msra.mxu1 %v2694_v54  ;;  %2516 = vmatprep.subr.bf16.mxu0 %v2772_v38 }
 0x24b   : > { %2423 = vmatprep.subr.bf16.mxu1 %v2695_v55 }
 0x24d   : > { %2517 = vmatpush3.bf16.msra.mxu0 %v2696_v56 }
 0x24e   : > { %2424 = vmatpush3.bf16.msra.mxu1 %v2697_v57 }
 0x24f   : > { %2425 = vmatprep.subr.bf16.mxu1 %v2698_v58 }
 0x252   : > { %2426 = vmatpush3.bf16.msra.mxu1 %v2699_v59 }
 0x2f0   : > { %v1710_v60 = vpop.f32.mrf.mxu0 }
 0x2f2   : > { %v2500_v61 = vpop.f32.mrf.mxu0 }
 0x2f4   : > { %v1713_v62 = vpop.f32.mrf.mxu0 }
 0x2f5   : > { %v2396_v63 = vpop.f32.mrf.mxu1 }
 0x2f6   : > { %v2501_v0 = vpop.f32.mrf.mxu0 }
 0x2f7   : > { %v2397_v1 = vpop.f32.mrf.mxu1 }
 0x2f8   : > { %v2398_v2 = vadd.f32 %v2397_v1, %v2396_v63 }
 0x2f9   : > { %v2399_v3 = vpop.f32.mrf.mxu1 }
 0x2fa   : > { %v1711_v38 = vadd.f32 %v2398_v2, %v1710_v60 }
 0x2fb   : > { %v2400_v4 = vpop.f32.mrf.mxu1 }
 0x2fc   : > { %v2401_v5 = vadd.f32 %v2400_v4, %v2399_v3  ;;  %v1717_v7 = vmax.f32 %v1711_v38, 0.0 }
 0x2fe   : > { %v1714_v6 = vadd.f32 %v2401_v5, %v1713_v62 }
 0x300   : > { %v1718_v8 = vmax.f32 %v1714_v6, 0.0 }
 0x302   : > { %v1719_v9 = vpack.c.bf16 %v1718_v8, %v1717_v7 }
 0x304   : > { %v1729_v10 = vrot.slane %v1719_v9, 1  ;;  %v1723_v11 = vshll.u32 %v1719_v9, 16  ;;  %v1721_v12 = vshrl.u32 %v1719_v9, 16 }
 0x306   : > { %2519 = vmatmul.mubr.bf16.vlgmr.msra.gmra.mxu0 %v1729_v10  ;;  %v1725_v13 = vrot.slane %v1723_v11, 1 }
 0x308   : > { %v1726_v14 = vor.u32 %v1725_v13, %v1721_v12 }
 0x30a   : > { %1955 = vmatprep.mubr.bf16.mxu1 %v1726_v14 }
 0x30b   : > { %1956 = vmatmul.mubr.bf16.vlgmr.msra.gmra.mxu1 %v1719_v9 }
 0x3c6   : > { %v1997_v15 = vpop.f32.mrf.mxu0 }
 0x3c8   : > { %v2520_v16 = vpop.f32.mrf.mxu0 }
 0x3ca   : > { %v2000_v17 = vpop.f32.mrf.mxu0 }
 0x3cb   : > { %v2427_v18 = vpop.f32.mrf.mxu1 }
 0x3cc   : > { %v2521_v19 = vpop.f32.mrf.mxu0 }
 0x3cd   : > { %v2428_v20 = vpop.f32.mrf.mxu1 }
 0x3ce   : > { %v2429_v21 = vadd.f32 %v2428_v20, %v2427_v18 }
 0x3cf   : > { %v2430_v23 = vpop.f32.mrf.mxu1 }
 0x3d0   : > { %v1998_v24 = vadd.f32 %v2429_v21, %v1997_v15 }
 0x3d1   : > { %v2431_v25 = vpop.f32.mrf.mxu1 }
 0x3d2   : > { %v2004_v26 = vmul.f32 %v2003_v22, %v1998_v24 }
 0x3d4   : > { %v2005_v27 = vadd.f32 %v2004_v26, %v1998_v24 }
 0x3d6   : > { %2006 = vst [vmem:[%s296_s17] sm:$0xff] %v2005_v27 }
 0x3d7 PF: > { %s18_s21 = sadd.s32 1, %s2766_s21  }
 0x3d8   : > { %p15_p3 = scmp.ge.s32.totalorder %s18_s21, 4  }
 0x3da   :  { %17 = sbr.rel (!%p15_p3) target bundleno = 2 (0x2), region = 86 }
 0x3df   :  { %2026 = vsyncpa [#allocation3], 1 }
 0x3e0   :  { %2028 = vsyncpa [#allocation3 + $0x1], 1 }
 0x3e1   :  { %2029 = vsyncpa [#allocation5], 1 }

</bundles_post_ra>
